<compile_context>
chip_gen: v5e
topology: v5e:2x2
jax: 0.10.0
libtpu: 0.0.40
codegen_flags: <defaults>
</compile_context>

<pallas_src>
import jax
import jax.numpy as jnp
from jax.experimental import pallas as pl
from jax.experimental.pallas import tpu as pltpu


def _round_up(x, m):
    return ((x + m - 1) // m) * m


def _fused_mlp_kernel(v_ref, w_ref, s_ref, l_ref,
                      w1_ref, b1_ref, w2_ref, b2_ref, o_ref):
    # v/w/s/l_ref : (tB, D)            w1_ref : (4, D, 4H)
    # b1_ref      : (1, 4H)            w2_ref : (4H, 4H)   b2_ref : (1, 4H)
    # o_ref       : (tB, 4H)
    #
    # Layer 1: each branch's dot lands in its own (zero-elsewhere) column
    # block of the shared hidden slab, so summing the four results is exact.
    h = jnp.dot(v_ref[...], w1_ref[0], preferred_element_type=jnp.float32)
    h = h + jnp.dot(w_ref[...], w1_ref[1], preferred_element_type=jnp.float32)
    h = h + jnp.dot(s_ref[...], w1_ref[2], preferred_element_type=jnp.float32)
    h = h + jnp.dot(l_ref[...], w1_ref[3], preferred_element_type=jnp.float32)
    h = jnp.maximum(h + b1_ref[...], 0.0)                       # bias + ReLU (f32)

    # Layer 2: block-diagonal matmul keeps branches independent, K = 4H.
    y = jnp.dot(h.astype(w2_ref.dtype), w2_ref[...],
                preferred_element_type=jnp.float32) + b2_ref[...]
    o_ref[...] = jnp.maximum(y, 0.0).astype(o_ref.dtype)        # ReLU, lane-dense store


def embed_sheep_wolf_landmark_fused(velocity, wolf_gf, sheep_gf, landmark_gf,
                                    fused, *, block_b=256):
    """Returns the fused embedding slab [B, 4*H] (lane-dense layout).

    `fused` comes from fuse_params(): w1 [4, D, 4H], b1 [1, 4H],
    w2 [4H, 4H] (block-diagonal), b2 [1, 4H].
    """
    B, D = velocity.shape
    H4 = fused["w1"].shape[-1]
    dtype = velocity.dtype

    # Tile over B; keep weights resident across all B-tiles.
    block_b = _round_up(block_b, 8)
    tB = min(block_b, _round_up(B, 8))
    Bp = _round_up(B, tB)
    if Bp != B:
        pad = ((0, Bp - B), (0, 0))
        velocity = jnp.pad(velocity, pad)
        wolf_gf = jnp.pad(wolf_gf, pad)
        sheep_gf = jnp.pad(sheep_gf, pad)
        landmark_gf = jnp.pad(landmark_gf, pad)

    itemsize = jnp.dtype(dtype).itemsize
    flops = 2 * Bp * (4 * D * H4 + H4 * H4)
    bytes_accessed = itemsize * (4 * Bp * D + 4 * D * H4 + H4 * H4 + 2 * H4 + Bp * H4)

    out = pl.pallas_call(
        _fused_mlp_kernel,
        out_shape=jax.ShapeDtypeStruct((Bp, H4), dtype),
        grid_spec=pltpu.PrefetchScalarGridSpec(
            num_scalar_prefetch=0,
            grid=(Bp // tB,),
            in_specs=[
                pl.BlockSpec((tB, D), lambda i: (i, 0)),        # velocity tile
                pl.BlockSpec((tB, D), lambda i: (i, 0)),        # wolf tile
                pl.BlockSpec((tB, D), lambda i: (i, 0)),        # sheep tile
                pl.BlockSpec((tB, D), lambda i: (i, 0)),        # landmark tile
                pl.BlockSpec((4, D, H4), lambda i: (0, 0, 0)),  # W1 fused (resident)
                pl.BlockSpec((1, H4), lambda i: (0, 0)),        # b1 fused
                pl.BlockSpec((H4, H4), lambda i: (0, 0)),       # W2 block-diag
                pl.BlockSpec((1, H4), lambda i: (0, 0)),        # b2 fused
            ],
            out_specs=pl.BlockSpec((tB, H4), lambda i: (i, 0)),
        ),
        compiler_params=pltpu.CompilerParams(
            dimension_semantics=("parallel",)),
        cost_estimate=pl.CostEstimate(flops=flops, transcendentals=0,
                                      bytes_accessed=bytes_accessed),
    )(velocity, wolf_gf, sheep_gf, landmark_gf,
      fused["w1"], fused["b1"], fused["w2"], fused["b2"])

    return out[:B]


def embed_sheep_wolf_landmark(velocity, wolf_gf, sheep_gf, landmark_gf,
                              fused, *, block_b=256):
    """PyTorch-compatible interface: returns the 4 branch embeddings.

    If the surrounding model can consume the fused [B, 4*H] slab directly,
    prefer embed_sheep_wolf_landmark_fused() and skip the slices below.
    """
    out = embed_sheep_wolf_landmark_fused(velocity, wolf_gf, sheep_gf,
                                          landmark_gf, fused, block_b=block_b)
    H = out.shape[-1] // 4
    return (out[:, 0 * H:1 * H], out[:, 1 * H:2 * H],
            out[:, 2 * H:3 * H], out[:, 3 * H:4 * H])


def init_params(key, input_dim, hidden_dim, n_branch=4, dtype=jnp.float32):
    """Per-branch params mimicking nn.Linear's U(-1/sqrt(fan_in), +1/sqrt(fan_in))."""
    ks = jax.random.split(key, 4)
    lim1 = 1.0 / float(jnp.sqrt(jnp.asarray(input_dim, jnp.float32)))
    lim2 = 1.0 / float(jnp.sqrt(jnp.asarray(hidden_dim, jnp.float32)))
    w1 = jax.random.uniform(ks[0], (n_branch, input_dim, hidden_dim), dtype, -lim1, lim1)
    b1 = jax.random.uniform(ks[1], (n_branch, 1, hidden_dim), dtype, -lim1, lim1)
    w2 = jax.random.uniform(ks[2], (n_branch, hidden_dim, hidden_dim), dtype, -lim2, lim2)
    b2 = jax.random.uniform(ks[3], (n_branch, 1, hidden_dim), dtype, -lim2, lim2)
    return {"w1": w1, "b1": b1, "w2": w2, "b2": b2}


def fuse_params(params, dtype=None):
    """Build the fused/block-diagonal weights ONCE (init time, not per call).

    Optionally cast to bf16 (dtype=jnp.bfloat16) on v6e/v7x for MXU-native
    matmuls; the kernel accumulates in f32 regardless.
    """
    w1, b1, w2, b2 = params["w1"], params["b1"], params["w2"], params["b2"]
    n, D, H = w1.shape
    H4 = n * H
    # W1 fused: branch b's weights occupy column block b of a [D, 4H] slab.
    w1f = jnp.zeros((n, D, H4), w1.dtype)
    for b in range(n):
        w1f = w1f.at[b, :, b * H:(b + 1) * H].set(w1[b])
    # W2 block-diagonal [4H, 4H].
    w2f = jnp.zeros((H4, H4), w2.dtype)
    for b in range(n):
        w2f = w2f.at[b * H:(b + 1) * H, b * H:(b + 1) * H].set(w2[b])
    b1f = b1.reshape(1, H4)
    b2f = b2.reshape(1, H4)
    fused = {"w1": w1f, "b1": b1f, "w2": w2f, "b2": b2f}
    if dtype is not None:
        fused = {k: v.astype(dtype) for k, v in fused.items()}
    return fused


def _reference(velocity, wolf_gf, sheep_gf, landmark_gf, params):
    outs = []
    for i, x in enumerate((velocity, wolf_gf, sheep_gf, landmark_gf)):
        h = jnp.maximum(x @ params["w1"][i] + params["b1"][i][0], 0.0)
        y = jnp.maximum(h @ params["w2"][i] + params["b2"][i][0], 0.0)
        outs.append(y)
    return tuple(outs)


if __name__ == "__main__":
    B, INPUT_DIM, HIDDEN_DIM = 8, 16, 32

    key = jax.random.PRNGKey(0)
    k_p, k_v, k_w, k_s, k_l = jax.random.split(key, 5)

    params = init_params(k_p, INPUT_DIM, HIDDEN_DIM)
    fused = fuse_params(params)          # built once, outside the call path

    velocity = jax.random.normal(k_v, (B, INPUT_DIM), jnp.float32)
    wolf_gf = jax.random.normal(k_w, (B, INPUT_DIM), jnp.float32)
    sheep_gf = jax.random.normal(k_s, (B, INPUT_DIM), jnp.float32)
    landmark_gf = jax.random.normal(k_l, (B, INPUT_DIM), jnp.float32)

    outs = embed_sheep_wolf_landmark(velocity, wolf_gf, sheep_gf, landmark_gf, fused)
    outs = jax.block_until_ready(outs)

    refs = _reference(velocity, wolf_gf, sheep_gf, landmark_gf, params)
    for o, r in zip(outs, refs):
        assert o.shape == (B, HIDDEN_DIM)
        assert jnp.allclose(o, r, atol=1e-4, rtol=1e-4)

    print("KERNEL_OK")
</pallas_src>

<mosaic_0001>
module attributes {stable_mosaic.version = 11 : i64} {
  func.func @_fused_mlp_kernel(%arg0: i32, %arg1: memref<8x16xf32, #tpu.memory_space<vmem>>, %arg2: memref<8x16xf32, #tpu.memory_space<vmem>>, %arg3: memref<8x16xf32, #tpu.memory_space<vmem>>, %arg4: memref<8x16xf32, #tpu.memory_space<vmem>>, %arg5: memref<4x16x128xf32, #tpu.memory_space<vmem>>, %arg6: memref<1x128xf32, #tpu.memory_space<vmem>>, %arg7: memref<128x128xf32, #tpu.memory_space<vmem>>, %arg8: memref<1x128xf32, #tpu.memory_space<vmem>>, %arg9: memref<8x128xf32, #tpu.memory_space<vmem>>) attributes {dimension_semantics = [#tpu.dimension_semantics<parallel>], iteration_bounds = array<i64: 1>, scalar_prefetch = 0 : i64, scratch_operands = 0 : i64, tpu.core_type = #tpu.core_type<tc>, window_params = [{transform_indices = @transform_0, window_bounds = array<i64: 8, 16>}, {transform_indices = @transform_1, window_bounds = array<i64: 8, 16>}, {transform_indices = @transform_2, window_bounds = array<i64: 8, 16>}, {transform_indices = @transform_3, window_bounds = array<i64: 8, 16>}, {pipeline_mode = #tpu.pipeline_mode<synchronous>, transform_indices = @transform_4, window_bounds = array<i64: 4, 16, 128>}, {pipeline_mode = #tpu.pipeline_mode<synchronous>, transform_indices = @transform_5, window_bounds = array<i64: 1, 128>}, {pipeline_mode = #tpu.pipeline_mode<synchronous>, transform_indices = @transform_6, window_bounds = array<i64: 128, 128>}, {pipeline_mode = #tpu.pipeline_mode<synchronous>, transform_indices = @transform_7, window_bounds = array<i64: 1, 128>}, {transform_indices = @transform_8, window_bounds = array<i64: 8, 128>}]} {
    %c0 = arith.constant 0 : index
    %c0_0 = arith.constant 0 : index
    %0 = vector.load %arg1[%c0, %c0_0] : memref<8x16xf32, #tpu.memory_space<vmem>>, vector<8x16xf32>
    %c0_1 = arith.constant 0 : index
    %c0_2 = arith.constant 0 : index
    %c0_3 = arith.constant 0 : index
    %1 = vector.load %arg5[%c0_1, %c0_2, %c0_3] : memref<4x16x128xf32, #tpu.memory_space<vmem>>, vector<1x16x128xf32>
    %2 = vector.shape_cast %1 : vector<1x16x128xf32> to vector<16x128xf32>
    %cst = arith.constant dense<0.000000e+00> : vector<8x128xf32>
    %3 = tpu.matmul %0, %2, %cst {dimension_numbers = #tpu.dot_dimension_numbers<[1], [0], [0], [1], [0, 0, 1, 1], [], []>} : vector<8x16xf32>, vector<16x128xf32>, vector<8x128xf32> -> vector<8x128xf32>
    %c0_4 = arith.constant 0 : index
    %c0_5 = arith.constant 0 : index
    %4 = vector.load %arg2[%c0_4, %c0_5] : memref<8x16xf32, #tpu.memory_space<vmem>>, vector<8x16xf32>
    %c1 = arith.constant 1 : index
    %c0_6 = arith.constant 0 : index
    %c0_7 = arith.constant 0 : index
    %5 = vector.load %arg5[%c1, %c0_6, %c0_7] : memref<4x16x128xf32, #tpu.memory_space<vmem>>, vector<1x16x128xf32>
    %6 = vector.shape_cast %5 : vector<1x16x128xf32> to vector<16x128xf32>
    %cst_8 = arith.constant dense<0.000000e+00> : vector<8x128xf32>
    %7 = tpu.matmul %4, %6, %cst_8 {dimension_numbers = #tpu.dot_dimension_numbers<[1], [0], [0], [1], [0, 0, 1, 1], [], []>} : vector<8x16xf32>, vector<16x128xf32>, vector<8x128xf32> -> vector<8x128xf32>
    %8 = arith.addf %3, %7 : vector<8x128xf32>
    %c0_9 = arith.constant 0 : index
    %c0_10 = arith.constant 0 : index
    %9 = vector.load %arg3[%c0_9, %c0_10] : memref<8x16xf32, #tpu.memory_space<vmem>>, vector<8x16xf32>
    %c2 = arith.constant 2 : index
    %c0_11 = arith.constant 0 : index
    %c0_12 = arith.constant 0 : index
    %10 = vector.load %arg5[%c2, %c0_11, %c0_12] : memref<4x16x128xf32, #tpu.memory_space<vmem>>, vector<1x16x128xf32>
    %11 = vector.shape_cast %10 : vector<1x16x128xf32> to vector<16x128xf32>
    %cst_13 = arith.constant dense<0.000000e+00> : vector<8x128xf32>
    %12 = tpu.matmul %9, %11, %cst_13 {dimension_numbers = #tpu.dot_dimension_numbers<[1], [0], [0], [1], [0, 0, 1, 1], [], []>} : vector<8x16xf32>, vector<16x128xf32>, vector<8x128xf32> -> vector<8x128xf32>
    %13 = arith.addf %8, %12 : vector<8x128xf32>
    %c0_14 = arith.constant 0 : index
    %c0_15 = arith.constant 0 : index
    %14 = vector.load %arg4[%c0_14, %c0_15] : memref<8x16xf32, #tpu.memory_space<vmem>>, vector<8x16xf32>
    %c3 = arith.constant 3 : index
    %c0_16 = arith.constant 0 : index
    %c0_17 = arith.constant 0 : index
    %15 = vector.load %arg5[%c3, %c0_16, %c0_17] : memref<4x16x128xf32, #tpu.memory_space<vmem>>, vector<1x16x128xf32>
    %16 = vector.shape_cast %15 : vector<1x16x128xf32> to vector<16x128xf32>
    %cst_18 = arith.constant dense<0.000000e+00> : vector<8x128xf32>
    %17 = tpu.matmul %14, %16, %cst_18 {dimension_numbers = #tpu.dot_dimension_numbers<[1], [0], [0], [1], [0, 0, 1, 1], [], []>} : vector<8x16xf32>, vector<16x128xf32>, vector<8x128xf32> -> vector<8x128xf32>
    %18 = arith.addf %13, %17 : vector<8x128xf32>
    %c0_19 = arith.constant 0 : index
    %c0_20 = arith.constant 0 : index
    %19 = vector.load %arg6[%c0_19, %c0_20] : memref<1x128xf32, #tpu.memory_space<vmem>>, vector<1x128xf32>
    %20 = vector.broadcast %19 : vector<1x128xf32> to vector<8x128xf32>
    %21 = arith.addf %18, %20 : vector<8x128xf32>
    %cst_21 = arith.constant 0.000000e+00 : f32
    %22 = vector.broadcast %cst_21 : f32 to vector<8x128xf32>
    %23 = arith.maximumf %21, %22 : vector<8x128xf32>
    %c0_22 = arith.constant 0 : index
    %c0_23 = arith.constant 0 : index
    %24 = vector.load %arg7[%c0_22, %c0_23] : memref<128x128xf32, #tpu.memory_space<vmem>>, vector<128x128xf32>
    %cst_24 = arith.constant dense<0.000000e+00> : vector<8x128xf32>
    %25 = tpu.matmul %23, %24, %cst_24 {dimension_numbers = #tpu.dot_dimension_numbers<[1], [0], [0], [1], [0, 0, 1, 1], [], []>} : vector<8x128xf32>, vector<128x128xf32>, vector<8x128xf32> -> vector<8x128xf32>
    %c0_25 = arith.constant 0 : index
    %c0_26 = arith.constant 0 : index
    %26 = vector.load %arg8[%c0_25, %c0_26] : memref<1x128xf32, #tpu.memory_space<vmem>>, vector<1x128xf32>
    %27 = vector.broadcast %26 : vector<1x128xf32> to vector<8x128xf32>
    %28 = arith.addf %25, %27 : vector<8x128xf32>
    %cst_27 = arith.constant 0.000000e+00 : f32
    %29 = vector.broadcast %cst_27 : f32 to vector<8x128xf32>
    %30 = arith.maximumf %28, %29 : vector<8x128xf32>
    %c0_28 = arith.constant 0 : index
    %c0_29 = arith.constant 0 : index
    %31 = vector.load %arg9[%c0_28, %c0_29] : memref<8x128xf32, #tpu.memory_space<vmem>>, vector<8x128xf32>
    tpu.vector_store %arg9[%c0_28, %c0_29], %30 {strides = array<i32>} : memref<8x128xf32, #tpu.memory_space<vmem>>, vector<8x128xf32>,
    return
  }
  func.func @transform_0(%arg0: i32) -> (i32, i32) {
    %c0_i32 = arith.constant 0 : i32
    %c0_i32_0 = arith.constant 0 : i32
    return %arg0, %c0_i32 : i32, i32
  }
  func.func @transform_1(%arg0: i32) -> (i32, i32) {
    %c0_i32 = arith.constant 0 : i32
    %c0_i32_0 = arith.constant 0 : i32
    return %arg0, %c0_i32 : i32, i32
  }
  func.func @transform_2(%arg0: i32) -> (i32, i32) {
    %c0_i32 = arith.constant 0 : i32
    %c0_i32_0 = arith.constant 0 : i32
    return %arg0, %c0_i32 : i32, i32
  }
  func.func @transform_3(%arg0: i32) -> (i32, i32) {
    %c0_i32 = arith.constant 0 : i32
    %c0_i32_0 = arith.constant 0 : i32
    return %arg0, %c0_i32 : i32, i32
  }
  func.func @transform_4(%arg0: i32) -> (i32, i32, i32) {
    %c0_i32 = arith.constant 0 : i32
    %c0_i32_0 = arith.constant 0 : i32
    %c0_i32_1 = arith.constant 0 : i32
    %c0_i32_2 = arith.constant 0 : i32
    return %c0_i32, %c0_i32_0, %c0_i32_1 : i32, i32, i32
  }
  func.func @transform_5(%arg0: i32) -> (i32, i32) {
    %c0_i32 = arith.constant 0 : i32
    %c0_i32_0 = arith.constant 0 : i32
    %c0_i32_1 = arith.constant 0 : i32
    return %c0_i32, %c0_i32_0 : i32, i32
  }
  func.func @transform_6(%arg0: i32) -> (i32, i32) {
    %c0_i32 = arith.constant 0 : i32
    %c0_i32_0 = arith.constant 0 : i32
    %c0_i32_1 = arith.constant 0 : i32
    return %c0_i32, %c0_i32_0 : i32, i32
  }
  func.func @transform_7(%arg0: i32) -> (i32, i32) {
    %c0_i32 = arith.constant 0 : i32
    %c0_i32_0 = arith.constant 0 : i32
    %c0_i32_1 = arith.constant 0 : i32
    return %c0_i32, %c0_i32_0 : i32, i32
  }
  func.func @transform_8(%arg0: i32) -> (i32, i32) {
    %c0_i32 = arith.constant 0 : i32
    %c0_i32_0 = arith.constant 0 : i32
    return %arg0, %c0_i32 : i32, i32
  }
}

</mosaic_0001>

<bundles_post_ra>
// kernel: tpu_custom_call.1
= control target key start
LH: loop header
LB: loop body
LE: loop exit
PB: predicated region body
PF: predicated region fallthrough
CT: control target
= control target key end

     0   :  { %13 = vsyncpa [#allocation3], 0  ;;  %s572_s0 = inlined_call_operand.hbm [shape: f32[8,16], index: 0, kind: input, shape index: {}]   ;;  %s573_s1 = inlined_call_operand.hbm [shape: f32[8,16], index: 1, kind: input, shape index: {}]   ;;  %s574_s2 = inlined_call_operand.hbm [shape: f32[8,16], index: 2, kind: input, shape index: {}]   ;;  %s575_s3 = inlined_call_operand.hbm [shape: f32[8,16], index: 3, kind: input, shape index: {}]   ;;  %s576_s4 = inlined_call_operand.hbm [shape: f32[4,16,128], index: 4, kind: input, shape index: {}]   ;;  %s577_s5 = inlined_call_operand.vmem [shape: f32[1,128], index: 5, kind: input, shape index: {}]   ;;  %s578_s6 = inlined_call_operand.hbm [shape: f32[128,128], index: 6, kind: input, shape index: {}]   ;;  %s579_s7 = inlined_call_operand.vmem [shape: f32[1,128], index: 7, kind: input, shape index: {}]   ;;  %s580_s8 = inlined_call_operand.hbm [shape: f32[8,128], index: 8, kind: output, shape index: {}]  }
   0x1   :  { %14 = vsyncpa [#allocation6], 0 }
   0x2   :  { %15 = vsyncpa [#allocation9], 0 }
   0x3   :  { %16 = vsyncpa [#allocation12], 0  ;;  %s34_s29 = sshll.u32 %s573_s1, 4  ;;  %s35_s29 = int_to_ptr.hbm [resolvable:$true] %s34_s29 }
   0x4   :  { %17 = vsyncpa [#allocation4], 0  ;;  %s487_s30 = smov [#allocation5]   ;;  %s56_s12 = sshll.u32 %s575_s3, 4  ;;  %s57_s12 = int_to_ptr.hbm [resolvable:$true] %s56_s12 }
   0x5   :  { %s36_s9 = sshll.u32 %s487_s30, 4  ;;  %s488_s13 = smov [#allocation8]   ;;  %s37_s9 = int_to_ptr.vmem [resolvable:$true] %s36_s9 }
   0x6   :  { %39 = dma.hbm_to_vmem [thread:$0]  %s35_s29, 128, %s37_s9, [#allocation6]  }
   0x7   :  { %s58_s14 = sshll.u32 %s488_s13, 4  ;;  %s23_s17 = sshll.u32 %s572_s0, 4  ;;  %s59_s14 = int_to_ptr.vmem [resolvable:$true] %s58_s14  ;;  %s24_s17 = int_to_ptr.hbm [resolvable:$true] %s23_s17 }
   0x8   :  { %61 = dma.hbm_to_vmem [thread:$0]  %s57_s12, 128, %s59_s14, [#allocation9]  }
   0x9   :  { %s45_s19 = sshll.u32 %s574_s2, 4  ;;  %s489_s20 = smov [#allocation2]   ;;  %s46_s19 = int_to_ptr.hbm [resolvable:$true] %s45_s19 }
   0xa   :  { %s25_s21 = sshll.u32 %s489_s20, 4  ;;  %s490_s3 = smov [#allocation7]   ;;  %s26_s21 = int_to_ptr.vmem [resolvable:$true] %s25_s21 }
   0xb   :  { %28 = dma.hbm_to_vmem [thread:$0]  %s24_s17, 128, %s26_s21, [#allocation3]  }
   0xc   :  { %s47_s22 = sshll.u32 %s490_s3, 4  ;;  %s66_s25 = sshll.u32 %s576_s4, 4  ;;  %s48_s22 = int_to_ptr.vmem [resolvable:$true] %s47_s22  ;;  %s67_s25 = int_to_ptr.hbm [resolvable:$true] %s66_s25 }
   0xd   :  { %50 = dma.hbm_to_vmem [thread:$0]  %s46_s19, 128, %s48_s22, [#allocation6]  }
   0xe   :  { %s491_s0 = smov [#allocation10]   ;;  %s81_s2 = sshll.u32 %s578_s6, 4  ;;  %s82_s2 = int_to_ptr.hbm [resolvable:$true] %s81_s2 }
   0xf   :  { %s68_s26 = sshll.u32 %s491_s0, 4  ;;  %s492_s29 = smov 128   ;;  %s69_s26 = int_to_ptr.vmem [resolvable:$true] %s68_s26 }
  0x10   :  { %s493_s30 = smov 8   ;;  %s494_s9 = smov [#allocation11]  }
  0x11   :  { %74 = dma.hbm_to_vmem [thread:$0]  %s67_s25, 1024, %s69_s26, [#allocation9], %s492_s29, %s492_s29, %s493_s30  }
  0x12   :  { %s83_s10 = sshll.u32 %s494_s9, 4  ;;  %s84_s10 = int_to_ptr.vmem [resolvable:$true] %s83_s10 }
  0x13   :  { %89 = dma.hbm_to_vmem [thread:$0]  %s82_s2, 2048, %s84_s10, [#allocation12], %s492_s29, %s492_s29, %s493_s30  }
  0x14   :  { %477 = dma.done.wait [#allocation3], 128  }
  0x15   :  { %478 = vsyncadd [#allocation3], 4294967168 }
  0x16   :  { %479 = dma.done.wait [#allocation6], 256  }
  0x17   :  { %480 = vsyncadd [#allocation6], 4294967040 }
  0x18   :  { %481 = dma.done.wait [#allocation9], 1152  }
  0x19   :  { %482 = vsyncadd [#allocation9], 4294966144 }
  0x1a   :  { %483 = dma.done.wait [#allocation12], 2048  }
  0x1b   :  { %484 = vsyncadd [#allocation12], 4294965248  ;;  %v122_v0 = vld [vmem:[#allocation10 + $0x18] sm:$0xff]  ;;  %v121_v1 = vld [vmem:[#allocation10 + $0x10] sm:$0xff]  ;;  %vm123_vm0 = vcmask 130048   ;;  %s495_s13 = smov [#allocation13]  }
  0x1c   :  { %141 = vmatpush.msra.mxu1 %v122_v0  ;;  %v119_v2 = vld [vmem:[#allocation5] sm:$0xff]  ;;  %v172_v4 = vld [vmem:[#allocation10 + $0x20] sm:$0xff]  ;;  %v201_v6 = vld [vmem:[#allocation10 + $0x38] sm:$0xff]  ;;  %s279_s14 = sshll.u32 %s495_s13, 4  ;;  %s281_s17 = sshll.u32 %s580_s8, 4  ;;  %s280_s14 = int_to_ptr.vmem [resolvable:$true] %s279_s14  ;;  %s282_s17 = int_to_ptr.hbm [resolvable:$true] %s281_s17 }
  0x1d   :  { %v173_v3 = vld [vmem:[#allocation10 + $0x28] sm:$0xff]  ;;  %v170_v7 = vld [vmem:[#allocation7] sm:$0xff]  ;;  %219 = vmatpush.msra.mxu3 %v201_v6  ;;  %v117_v9 = vld [vmem:[#allocation10] sm:$0xff] }
  0x1e   :  { %v118_v5 = vld [vmem:[#allocation10 + $0x8] sm:$0xff]  ;;  %191 = vmatpush.msra.mxu2 %v173_v3  ;;  %142 = vmatpush.msra.mxu1 %v121_v1  ;;  %v200_v8 = vld [vmem:[#allocation10 + $0x30] sm:$0xff]  ;;  %v198_v10 = vld [vmem:[#allocation8] sm:$0xff] }
  0x1f   :  { %294 = vmatmul.msk.f32.vlgmr.msra.gmra.mxu1 %vm123_vm0, %v119_v2  ;;  %v247_v11 = vld [vmem:[#allocation11 + $0x78] sm:$0xff]  ;;  %v246_v12 = vld [vmem:[#allocation11 + $0x70] sm:$0xff]  ;;  %220 = vmatpush.msra.mxu3 %v200_v8  ;;  %v245_v13 = vld [vmem:[#allocation11 + $0x68] sm:$0xff] }
  0x20   :  { %192 = vmatpush.msra.mxu2 %v172_v4  ;;  %164 = vmatpush.msrb.mxu1 %v118_v5  ;;  %v116_v14 = vld [vmem:[#allocation2] sm:$0xff]  ;;  %v243_v16 = vld [vmem:[#allocation11 + $0x58] sm:$0xff]  ;;  %v242_v17 = vld [vmem:[#allocation11 + $0x50] sm:$0xff] }
  0x21   :  { %296 = vmatmul.msk.f32.vlgmr.msra.gmra.mxu2 %vm123_vm0, %v170_v7  ;;  %252 = vmatpush.msra.mxu0 %v247_v11  ;;  %v244_v15 = vld [vmem:[#allocation11 + $0x60] sm:$0xff]  ;;  %v241_v18 = vld [vmem:[#allocation11 + $0x48] sm:$0xff]  ;;  %v239_v20 = vld [vmem:[#allocation11 + $0x38] sm:$0xff] }
  0x22   :  { %165 = vmatpush.msrb.mxu1 %v117_v9  ;;  %297 = vmatmul.msk.f32.vlgmr.msra.gmra.mxu3 %vm123_vm0, %v198_v10  ;;  %v240_v19 = vld [vmem:[#allocation11 + $0x40] sm:$0xff]  ;;  %v238_v21 = vld [vmem:[#allocation11 + $0x30] sm:$0xff]  ;;  %v237_v22 = vld [vmem:[#allocation11 + $0x28] sm:$0xff] }
  0x23   :  { %253 = vmatpush.msra.mxu0 %v246_v12  ;;  %v236_v23 = vld [vmem:[#allocation11 + $0x20] sm:$0xff]  ;;  %v235_v24 = vld [vmem:[#allocation11 + $0x18] sm:$0xff]  ;;  %v234_v25 = vld [vmem:[#allocation11 + $0x10] sm:$0xff] }
  0x24   :  { %v233_v26 = vld [vmem:[#allocation11 + $0x8] sm:$0xff]  ;;  %v232_v27 = vld [vmem:[#allocation11] sm:$0xff] }
  0x25   :  { %254 = vmatpush.msra.mxu0 %v245_v13  ;;  %v307_v34 = vld [vmem:[%s577_s5] ss:$0 sm:$0xff] }
  0x26   :  { %v308_v38 = vld [vmem:[%s579_s7] ss:$0 sm:$0xff] }
  0x27   :  { %295 = vmatmul.msk.f32.vlgmr.msrb.gmra.mxu1 %vm123_vm0, %v116_v14  ;;  %255 = vmatpush.msra.mxu0 %v244_v15 }
  0x29   :  { %256 = vmatpush.msra.mxu0 %v243_v16 }
  0x2b   :  { %257 = vmatpush.msra.mxu0 %v242_v17 }
  0x2d   :  { %258 = vmatpush.msra.mxu0 %v241_v18 }
  0x2f   :  { %259 = vmatpush.msra.mxu0 %v240_v19 }
  0x31   :  { %260 = vmatpush.msra.mxu0 %v239_v20 }
  0x33   :  { %261 = vmatpush.msra.mxu0 %v238_v21 }
  0x35   :  { %262 = vmatpush.msra.mxu0 %v237_v22 }
  0x37   :  { %263 = vmatpush.msra.mxu0 %v236_v23 }
  0x39   :  { %264 = vmatpush.msra.mxu0 %v235_v24 }
  0x3b   :  { %265 = vmatpush.msra.mxu0 %v234_v25 }
  0x3d   :  { %266 = vmatpush.msra.mxu0 %v233_v26 }
  0x3f   :  { %267 = vmatpush.msra.mxu0 %v232_v27 }
  0x9c   :  { %v144_v28 = vpop.f32.mrf.mxu1 }
  0xa4   :  { %v167_v29 = vpop.f32.mrf.mxu1  ;;  %v194_v30 = vpop.f32.mrf.mxu2 }
  0xa5   :  { %v168_v31 = vadd.f32 %v167_v29, %v144_v28  ;;  %v222_v32 = vpop.f32.mrf.mxu3 }
  0xa7   :  { %v197_v33 = vadd.f32 %v194_v30, %v168_v31 }
  0xa9   :  { %v225_v35 = vadd.f32 %v222_v32, %v197_v33 }
  0xab   :  { %v230_v36 = vadd.f32 %v307_v34, %v225_v35 }
  0xad   :  { %v231_v37 = vmax.f32 %v230_v36, 0.0 }
  0xaf   :  { %268 = vmatmul.f32.vlgmr.msra.gmra.mxu0 %v231_v37 }
 0x12c   :  { %v269_v39 = vpop.f32.mrf.mxu0 }
 0x12d   :  { %v270_v40 = vadd.f32 %v308_v38, %v269_v39 }
 0x12f   :  { %v272_v41 = vmax.f32 %v270_v40, 0.0 }
 0x131   :  { %273 = vst [vmem:[#allocation13] sm:$0xff] %v272_v41 }
 0x132   :  { %284 = dma.vmem_to_hbm [thread:$0]  %s280_s14, 128, %s282_s17, [#allocation4]  }
 0x133   :  { %485 = dma.done.wait [#allocation4], 128  }
 0x134   :  { %486 = vsyncadd [#allocation4], 4294967168 }
 0x135   :  { %289 = vsyncpa [#allocation3], 1 }
 0x136   :  { %290 = vsyncpa [#allocation6], 1 }
 0x137   :  { %291 = vsyncpa [#allocation9], 1 }
 0x138   :  { %292 = vsyncpa [#allocation12], 1 }
 0x139   :  { %293 = vsyncpa [#allocation4], 1 }

</bundles_post_ra>
